<compile_context>
chip_gen: v5e
topology: v5e:2x2
jax: 0.10.0
libtpu: 0.0.40
codegen_flags: <defaults>
</compile_context>

<pallas_src>
import functools

import jax
import jax.numpy as jnp
from jax.experimental import pallas as pl
from jax.experimental.pallas import tpu as pltpu


def _pick_tile(dim, preferred, align):
    """Largest tile <= `preferred` that is a multiple of `align` and <= dim,
    or the full dim when the dim is smaller than one aligned tile."""
    if dim <= align:
        return dim                       # full-dim block: always legal
    return min(preferred, align * (dim // align))


def _lin_kernel(x_ref, w_ref, b_ref, o_ref, *, k_rem):
    # x: (tm, tk)   w: (tn, tk)  (PyTorch (out, in) layout)
    # b: (1, tn)    o: (tm, tn)  f32, resident across the K grid axis.
    k = pl.program_id(2)

    # Initialize the resident output tile with the bias (no finalize add).
    @pl.when(k == 0)
    def _init():
        o_ref[...] = jnp.broadcast_to(
            b_ref[...].astype(o_ref.dtype), o_ref.shape
        )

    x_tile = x_ref[...]
    w_tile = w_ref[...]

    if k_rem:
        # The last K block is partial: zero the out-of-range K columns of
        # both tiles so garbage from the partial HBM->VMEM copy cannot
        # corrupt the reduction.  (M/N tails need no masking: those output
        # rows/cols are never written back.)
        tk = x_tile.shape[-1]
        valid = jnp.where(k == pl.num_programs(2) - 1,
                          jnp.int32(k_rem), jnp.int32(tk))
        cols_x = jax.lax.broadcasted_iota(jnp.int32, x_tile.shape, 1)
        x_tile = jnp.where(cols_x < valid, x_tile, 0.0)
        cols_w = jax.lax.broadcasted_iota(jnp.int32, w_tile.shape, 1)
        w_tile = jnp.where(cols_w < valid, w_tile, 0.0)

    # x @ w.T for this tile: contract dim 1 of both operands; accumulate
    # straight into the f32 output block (no separate accumulator scratch).
    o_ref[...] += jax.lax.dot_general(
        x_tile, w_tile,
        dimension_numbers=(((1,), (1,)), ((), ())),
        preferred_element_type=jnp.float32,
    ).astype(o_ref.dtype)


@functools.partial(jax.jit, static_argnames=("tm", "tn", "tk"))
def lin_bidirectional_forward(x, w, b, *, tm=512, tn=512, tk=1024):
    """x: (B, C), w: (C, C) in PyTorch (out, in) layout, b: (C,) -> x @ w.T + b."""
    B, C = x.shape
    assert w.shape == (C, C) and b.shape == (C,)

    # Tiles: full dim for small dims, otherwise 8/128-aligned and <= dim.
    tm = _pick_tile(B, tm, 8)
    tn = _pick_tile(C, tn, 128)
    tk = _pick_tile(C, tk, 128)

    # If the whole batch fits in one M tile, split N so both v7x TensorCores
    # get at least one parallel tile (no effect on single-TC v5e/v6e).
    if pl.cdiv(B, tm) == 1 and C > 256:
        tn = min(tn, max(128, 128 * ((C // 2) // 128)))

    grid_m = pl.cdiv(B, tm)
    grid_n = pl.cdiv(C, tn)
    grid_k = pl.cdiv(C, tk)
    k_rem = C % tk  # static; nonzero => last K block is partial

    b2d = b.reshape(1, C)

    cost = pl.CostEstimate(
        flops=2 * (grid_m * tm) * (grid_n * tn) * (grid_k * tk),
        transcendentals=0,
        bytes_accessed=4 * (B * C * grid_n      # x re-streamed per N block
                            + C * C * grid_m    # W re-streamed per M block
                            + C * grid_m        # bias
                            + B * C),           # output
    )

    kernel = functools.partial(_lin_kernel, k_rem=k_rem)

    return pl.pallas_call(
        kernel,
        out_shape=jax.ShapeDtypeStruct((B, C), x.dtype),
        grid=(grid_m, grid_n, grid_k),
        in_specs=[
            pl.BlockSpec((tm, tk), lambda i, j, k: (i, k)),   # x tile
            pl.BlockSpec((tn, tk), lambda i, j, k: (j, k)),   # W tile ((out,in) layout)
            pl.BlockSpec((1, tn), lambda i, j, k: (0, j)),    # bias tile
        ],
        out_specs=pl.BlockSpec((tm, tn), lambda i, j, k: (i, j)),
        compiler_params=pltpu.CompilerParams(
            dimension_semantics=("parallel", "parallel", "arbitrary"),
        ),
        cost_estimate=cost,
    )(x, w, b2d)


def make_orthogonal(key, n):
    """Deterministic orthogonal init (analogue of torch.nn.init.orthogonal_)."""
    a = jax.random.normal(key, (n, n), dtype=jnp.float32)
    q, r = jnp.linalg.qr(a)
    d = jnp.sign(jnp.diag(r))
    return q * d[None, :]


def make_normal_batch(key, size, batch_size):
    # MultivariateNormal(zeros, I).sample((batch_size,)) == standard normal.
    return jax.random.normal(key, (batch_size, size), dtype=jnp.float32)


if __name__ == "__main__":
    hparams = {"channels": 32, "batch_size": 8}

    key = jax.random.PRNGKey(0)
    k_x, k_w = jax.random.split(key)

    x = make_normal_batch(k_x, hparams["channels"], hparams["batch_size"])
    w = make_orthogonal(k_w, hparams["channels"])
    b = jnp.zeros((hparams["channels"],), dtype=jnp.float32)

    out = jax.block_until_ready(lin_bidirectional_forward(x, w, b))
    ref = x @ w.T + b[None, :]
    assert out.shape == (hparams["batch_size"], hparams["channels"])
    assert jnp.allclose(out, ref, atol=1e-5, rtol=1e-5)

    # Larger shape exercising a multi-block grid with partial M/N tail blocks
    # and the in-kernel K-tail mask (grid (2, 2, 2), K remainder 60).
    kx2, kw2 = jax.random.split(jax.random.PRNGKey(1))
    x2 = jax.random.normal(kx2, (300, 700), dtype=jnp.float32)
    w2 = jax.random.normal(kw2, (700, 700), dtype=jnp.float32) * 0.05
    b2 = jnp.ones((700,), dtype=jnp.float32)
    out2 = jax.block_until_ready(lin_bidirectional_forward(x2, w2, b2))
    ref2 = x2 @ w2.T + b2[None, :]
    assert jnp.allclose(out2, ref2, atol=1e-3, rtol=1e-3)

    print("KERNEL_OK")
</pallas_src>

<mosaic_0001>
module attributes {stable_mosaic.version = 11 : i64} {
  func.func @_lin_kernel(%arg0: i32, %arg1: i32, %arg2: i32, %arg3: memref<8x32xf32, #tpu.memory_space<vmem>>, %arg4: memref<32x32xf32, #tpu.memory_space<vmem>>, %arg5: memref<1x32xf32, #tpu.memory_space<vmem>>, %arg6: memref<8x32xf32, #tpu.memory_space<vmem>>) attributes {dimension_semantics = [#tpu.dimension_semantics<parallel>, #tpu.dimension_semantics<parallel>, #tpu.dimension_semantics<arbitrary>], iteration_bounds = array<i64: 1, 1, 1>, scalar_prefetch = 0 : i64, scratch_operands = 0 : i64, tpu.core_type = #tpu.core_type<tc>, window_params = [{transform_indices = @transform_0, window_bounds = array<i64: 8, 32>}, {transform_indices = @transform_1, window_bounds = array<i64: 32, 32>}, {transform_indices = @transform_2, window_bounds = array<i64: 1, 32>}, {transform_indices = @transform_3, window_bounds = array<i64: 8, 32>}]} {
    %c0_i32 = arith.constant 0 : i32
    %0 = arith.cmpi eq, %arg2, %c0_i32 : i32
    %1 = arith.extui %0 : i1 to i32
    %c0_i32_0 = arith.constant 0 : i32
    %2 = arith.cmpi ne, %1, %c0_i32_0 : i32
    scf.if %2 {
      %c0_8 = arith.constant 0 : index
      %c0_9 = arith.constant 0 : index
      %9 = vector.load %arg5[%c0_8, %c0_9] : memref<1x32xf32, #tpu.memory_space<vmem>>, vector<1x32xf32>
      %10 = vector.shape_cast %9 : vector<1x32xf32> to vector<1x32xf32>
      %11 = vector.broadcast %10 : vector<1x32xf32> to vector<8x32xf32>
      %c0_10 = arith.constant 0 : index
      %c0_11 = arith.constant 0 : index
      %12 = vector.load %arg6[%c0_10, %c0_11] : memref<8x32xf32, #tpu.memory_space<vmem>>, vector<8x32xf32>
      tpu.vector_store %arg6[%c0_10, %c0_11], %11 {strides = array<i32>} : memref<8x32xf32, #tpu.memory_space<vmem>>, vector<8x32xf32>,
    } else {
    }
    %c0 = arith.constant 0 : index
    %c0_1 = arith.constant 0 : index
    %3 = vector.load %arg3[%c0, %c0_1] : memref<8x32xf32, #tpu.memory_space<vmem>>, vector<8x32xf32>
    %c0_2 = arith.constant 0 : index
    %c0_3 = arith.constant 0 : index
    %4 = vector.load %arg4[%c0_2, %c0_3] : memref<32x32xf32, #tpu.memory_space<vmem>>, vector<32x32xf32>
    %c0_4 = arith.constant 0 : index
    %c0_5 = arith.constant 0 : index
    %5 = vector.load %arg6[%c0_4, %c0_5] : memref<8x32xf32, #tpu.memory_space<vmem>>, vector<8x32xf32>
    %cst = arith.constant dense<0.000000e+00> : vector<8x32xf32>
    %6 = tpu.matmul %3, %4, %cst {dimension_numbers = #tpu.dot_dimension_numbers<[1], [1], [0], [0], [0, 0, 1, 0], [], []>} : vector<8x32xf32>, vector<32x32xf32>, vector<8x32xf32> -> vector<8x32xf32>
    %7 = arith.addf %5, %6 : vector<8x32xf32>
    %c0_6 = arith.constant 0 : index
    %c0_7 = arith.constant 0 : index
    %8 = vector.load %arg6[%c0_6, %c0_7] : memref<8x32xf32, #tpu.memory_space<vmem>>, vector<8x32xf32>
    tpu.vector_store %arg6[%c0_6, %c0_7], %7 {strides = array<i32>} : memref<8x32xf32, #tpu.memory_space<vmem>>, vector<8x32xf32>,
    return
  }
  func.func @transform_0(%arg0: i32, %arg1: i32, %arg2: i32) -> (i32, i32) {
    %c0_i32 = arith.constant 0 : i32
    return %arg0, %arg2 : i32, i32
  }
  func.func @transform_1(%arg0: i32, %arg1: i32, %arg2: i32) -> (i32, i32) {
    %c0_i32 = arith.constant 0 : i32
    return %arg1, %arg2 : i32, i32
  }
  func.func @transform_2(%arg0: i32, %arg1: i32, %arg2: i32) -> (i32, i32) {
    %c0_i32 = arith.constant 0 : i32
    %c0_i32_0 = arith.constant 0 : i32
    return %c0_i32, %arg1 : i32, i32
  }
  func.func @transform_3(%arg0: i32, %arg1: i32, %arg2: i32) -> (i32, i32) {
    %c0_i32 = arith.constant 0 : i32
    return %arg0, %arg1 : i32, i32
  }
}

</mosaic_0001>

<bundles_post_ra>
// kernel: lin_bidirectional_forward.1
= control target key start
LH: loop header
LB: loop body
LE: loop exit
PB: predicated region body
PF: predicated region fallthrough
CT: control target
= control target key end

     0   :  { %8 = vsyncpa [#allocation3], 0  ;;  %s250_s0 = inlined_call_operand.hbm [shape: f32[8,32], index: 0, kind: input, shape index: {}]   ;;  %s251_s1 = inlined_call_operand.hbm [shape: f32[32,32], index: 1, kind: input, shape index: {}]   ;;  %s252_s2 = inlined_call_operand.vmem [shape: f32[1,32], index: 2, kind: input, shape index: {}]   ;;  %s253_s3 = inlined_call_operand.hbm [shape: f32[8,32], index: 3, kind: output, shape index: {}]  }
   0x1   :  { %9 = vsyncpa [#allocation6], 0 }
   0x2   :  { %10 = vsyncpa [#allocation4], 0  ;;  %s16_s14 = sshll.u32 %s250_s0, 4  ;;  %s206_s15 = smov [#allocation2]   ;;  %s17_s14 = int_to_ptr.hbm [resolvable:$true] %s16_s14 }
   0x3   :  { %s18_s16 = sshll.u32 %s206_s15, 4  ;;  %s26_s19 = sshll.u32 %s251_s1, 4  ;;  %s19_s16 = int_to_ptr.vmem [resolvable:$true] %s18_s16  ;;  %s27_s19 = int_to_ptr.hbm [resolvable:$true] %s26_s19 }
   0x4   :  { %21 = dma.hbm_to_vmem [thread:$0]  %s17_s14, 128, %s19_s16, [#allocation3]  }
   0x5   :  { %s207_s20 = smov [#allocation5]   ;;  %s208_s22 = smov 128  }
   0x6   :  { %s28_s21 = sshll.u32 %s207_s20, 4  ;;  %s209_s23 = smov 8   ;;  %s29_s21 = int_to_ptr.vmem [resolvable:$true] %s28_s21 }
   0x7   :  { %34 = dma.hbm_to_vmem [thread:$0]  %s27_s19, 512, %s29_s21, [#allocation6], %s208_s22, %s208_s22, %s209_s23  }
   0x8   :  { %200 = dma.done.wait [#allocation3], 128  }
   0x9   :  { %201 = vsyncadd [#allocation3], 4294967168 }
   0xa   :  { %202 = dma.done.wait [#allocation6], 512  }
   0xb   :  { %203 = vsyncadd [#allocation6], 4294966784  ;;  %vm53_vm0 = vcmask 261120   ;;  %v127_v0 = vld [vmem:[%s252_s2] ss:$0 sm:$0xff]  ;;  %v58_v2 = vld [vmem:[#allocation5 + $0x10] sm:$0xff] }
   0xc   :  { %v59_v1 = vld [vmem:[#allocation5 + $0x18] sm:$0xff]  ;;  %54 = vst.msk [vmem:[#allocation7] sm:$0xff] %vm53_vm0, %v127_v0  ;;  %v57_v3 = vld [vmem:[#allocation5 + $0x8] sm:$0xff]  ;;  %v56_v4 = vld [vmem:[#allocation5] sm:$0xff]  ;;  %s210_s1 = smov [#allocation7]   ;;  %s106_s27 = sshll.u32 %s253_s3, 4  ;;  %s107_s27 = int_to_ptr.hbm [resolvable:$true] %s106_s27 }
   0xd   :  { %117 = vmatpush.xpose.msk.msra.mxu0 %vm53_vm0, %v59_v1  ;;  %v55_v5 = vld [vmem:[#allocation2] sm:$0xff]  ;;  %s104_s2 = sshll.u32 %s210_s1, 4  ;;  %s105_s2 = int_to_ptr.vmem [resolvable:$true] %s104_s2 }
  0x11   :  { %118 = vmatpush.xpose.msk.msra.mxu0 %vm53_vm0, %v58_v2 }
  0x13   :  { %v60_v6 = vld [vmem:[#allocation7] sm:$0xff] }
  0x15   :  { %119 = vmatpush.xpose.msk.msra.mxu0 %vm53_vm0, %v57_v3 }
  0x19   :  { %120 = vmatpush.xpose.msk.msra.mxu0 %vm53_vm0, %v56_v4 }
  0x1c   :  { %121 = vmatmul.msk.f32.vlgmr.msra.gmra.mxu0 %vm53_vm0, %v55_v5 }
  0x99   :  { %v94_v7 = vpop.f32.mrf.mxu0 }
  0x9a   :  { %v97_v8 = vadd.f32 %v94_v7, %v60_v6 }
  0x9c   :  { %98 = vst.msk [vmem:[#allocation7] sm:$0xff] %vm53_vm0, %v97_v8 }
  0x9d   :  { %109 = dma.vmem_to_hbm [thread:$0]  %s105_s2, 128, %s107_s27, [#allocation4]  }
  0x9e   :  { %204 = dma.done.wait [#allocation4], 128  }
  0x9f   :  { %205 = vsyncadd [#allocation4], 4294967168 }
  0xa0   :  { %114 = vsyncpa [#allocation3], 1 }
  0xa1   :  { %115 = vsyncpa [#allocation6], 1 }
  0xa2   :  { %116 = vsyncpa [#allocation4], 1 }

</bundles_post_ra>
